<compile_context>
chip_gen: v7x
topology: tpu7x:2x2x1
jax: 0.10.0
libtpu: 0.0.40
codegen_flags: <defaults>
</compile_context>

<pallas_src>
import jax
import jax.numpy as jnp
from jax import lax
from jax.experimental import pallas as pl
from jax.experimental.pallas import tpu as pltpu


def _round_up(x: int, m: int) -> int:
    return ((x + m - 1) // m) * m


def _make_kernel(d_actual: int, td: int, tb: int, n_valid: int,
                 grid_d: int, has_oob: bool):
    """Per-sample partial sum-of-squares into a lane-dense (tb, 128) block."""
    ragged = (d_actual % td) != 0
    n_slices = td // 128

    def kernel(g_ref, out_ref):
        p = pl.program_id(0)          # D-half (parallel)
        k = pl.program_id(2)          # D tile within the half (reduction, last)

        @pl.when(k == 0)
        def _():
            out_ref[...] = jnp.zeros_like(out_ref)

        blk = p * grid_d + k          # logical TD-wide block index along D

        def accumulate(mask_cols):
            acc = jnp.zeros((tb, 128), jnp.float32)
            for j in range(n_slices):                       # 128-lane slices
                col = g_ref[:, j * 128:(j + 1) * 128].astype(jnp.float32)
                if mask_cols:
                    idx = blk * td + j * 128 + lax.broadcasted_iota(
                        jnp.int32, (tb, 128), 1)
                    # Mask BEFORE squaring (OOB region may hold garbage).
                    col = jnp.where(idx < d_actual, col, 0.0)
                acc = acc + col * col                        # pure VPU
            out_ref[...] += acc

        if (not ragged) and (not has_oob):
            accumulate(False)                                # hot path, no branch
        else:
            last = n_valid - 1
            if ragged:
                pl.when(blk < last)(lambda: accumulate(False))
                pl.when(blk == last)(lambda: accumulate(True))
                # blk > last (at most one fully out-of-range tile): contributes 0.
            else:
                pl.when(blk <= last)(lambda: accumulate(False))

    return kernel


def _per_sample_sumsq_impl(g2):
    """ss[b] = sum(g2[b, :]^2) in f32, streaming reduction in Pallas."""
    B, D = g2.shape

    # ---- batch tiling (dtype-aware sublane packing) -------------------------
    itemsize = jnp.dtype(g2.dtype).itemsize
    sub = {4: 8, 2: 16, 1: 32}.get(itemsize, 8)
    TB = min(128, _round_up(max(B, 1), sub))
    grid_b = pl.cdiv(B, TB)
    B_pad = grid_b * TB
    if B_pad != B:
        # Zero rows are harmless: ss == 0 there and they are sliced off below.
        g2 = jnp.pad(g2, ((0, B_pad - B), (0, 0)))

    # ---- reduction (D) tiling ------------------------------------------------
    # 8192 lanes * 128 rows * 4 B = 4 MiB/buffer -> 8 MiB double-buffered:
    # the portable ceiling (fits v7x 64 MiB physical / v5e 16->32 MiB scoped).
    TD = 8192 if D >= 8192 else _round_up(D, 128)
    n_valid = pl.cdiv(D, TD)                 # D blocks that overlap the array
    P = 2 if n_valid >= 2 else 1             # parallel D-split (v7x megacore)
    grid_d = pl.cdiv(n_valid, P)
    has_oob = (P * grid_d) > n_valid         # at most one fully-OOB logical tile

    if has_oob:
        # Clamp the DMA to an in-bounds block; the kernel skips its contribution.
        in_index_map = lambda p, b, k: (b, jnp.minimum(p * grid_d + k, n_valid - 1))
    else:
        in_index_map = lambda p, b, k: (b, p * grid_d + k)

    partial = pl.pallas_call(
        _make_kernel(D, TD, TB, n_valid, grid_d, has_oob),
        out_shape=jax.ShapeDtypeStruct((B_pad, P * 128), jnp.float32),
        grid=(P, grid_b, grid_d),
        in_specs=[
            # Native dtype streamed from HBM; f32 cast happens per 128-lane
            # slice inside the kernel.  (Optional sweep: pipeline_mode=
            # pl.Buffered(3) once TD is large — low-single-digit % at best.)
            pl.BlockSpec((TB, TD), in_index_map),
        ],
        out_specs=pl.BlockSpec((TB, 128), lambda p, b, k: (b, p)),
        compiler_params=pltpu.CompilerParams(
            dimension_semantics=("parallel", "parallel", "arbitrary"),
            vmem_limit_bytes=32 * 1024 * 1024,
        ),
    )(g2)

    # O(B * P * 128) epilogue in plain JAX; padded batch rows excluded here.
    return partial.sum(axis=1)[:B]


@jax.custom_vjp
def _per_sample_sumsq(g2):
    return _per_sample_sumsq_impl(g2)


def _per_sample_sumsq_fwd(g2):
    return _per_sample_sumsq_impl(g2), g2


def _per_sample_sumsq_bwd(g2, ct):
    # d/dg of sum(g^2, axis=1) with cotangent ct (B,) is 2 * g * ct[:, None].
    # Elementwise: plain JAX/XLA is already bandwidth-optimal here.
    g_ct = (2.0 * g2.astype(jnp.float32) * ct[:, None]).astype(g2.dtype)
    return (g_ct,)


_per_sample_sumsq.defvjp(_per_sample_sumsq_fwd, _per_sample_sumsq_bwd)


def gradient_penalty_from_grad(grad):
    """penalty = mean((1 - ||grad_b||_2)^2); hot reduction runs in Pallas."""
    B = grad.shape[0]
    g2 = grad.reshape(B, -1)                  # native dtype, no f32 HBM copy
    ss = _per_sample_sumsq(g2)                # (B,) f32
    norms = jnp.sqrt(ss)
    return jnp.mean((1.0 - norms) ** 2)


def gradient_penalty(inputs, critic_fn):
    """Mirror of GradientPenalty.forward(inputs, outputs).

    PyTorch passes (inputs, outputs) connected through the autograd graph; in
    JAX the graph is the function, so we take the critic function and compute
    the same VJP with ones_like(outputs).
    """
    # TODO(synk): torch.autograd.grad has no Pallas equivalent; the VJP is
    # plain-JAX glue, the penalty reduction is the Pallas kernel above.
    outputs, vjp = jax.vjp(critic_fn, inputs)
    (grad,) = vjp(jnp.ones_like(outputs))
    return gradient_penalty_from_grad(grad)


if __name__ == "__main__":
    # Small NCHW shapes: batch=2, channels=4, spatial=16x16 (D = 1024).
    B, C, H, W = 2, 4, 16, 16
    key = jax.random.PRNGKey(0)
    k_x, k_w = jax.random.split(key)
    x = jax.random.normal(k_x, (B, C, H, W), dtype=jnp.float32)
    w = jax.random.normal(k_w, (C * H * W,), dtype=jnp.float32) * 0.05

    # Deterministic synthetic "critic" (mildly nonlinear so the penalty has a
    # nontrivial gradient w.r.t. x, exercising the second-order path).
    def critic_fn(inp):
        flat = inp.reshape(inp.shape[0], -1)
        return jnp.tanh(flat @ w) + 0.01 * jnp.sum(flat * flat, axis=1)

    penalty = gradient_penalty(x, critic_fn)
    penalty = jax.block_until_ready(penalty)

    # Pure-JAX reference of the same math.
    def reference_penalty(inp):
        outputs, vjp = jax.vjp(critic_fn, inp)
        (grad_ref,) = vjp(jnp.ones_like(outputs))
        g = grad_ref.reshape(inp.shape[0], -1).astype(jnp.float32)
        norms = jnp.sqrt(jnp.sum(g * g, axis=1))
        return jnp.mean((1.0 - norms) ** 2)

    ref = reference_penalty(x)
    assert jnp.allclose(penalty, ref, rtol=1e-5, atol=1e-5), (penalty, ref)

    # WGAN-GP path: the penalty must be differentiable w.r.t. the inputs
    # (custom_vjp on the Pallas reduction makes this well-defined).
    gp_grad = jax.grad(lambda inp: gradient_penalty(inp, critic_fn))(x)
    ref_grad = jax.grad(reference_penalty)(x)
    gp_grad = jax.block_until_ready(gp_grad)
    assert jnp.allclose(gp_grad, ref_grad, rtol=1e-4, atol=1e-6), "grad mismatch"

    print("KERNEL_OK")
</pallas_src>

<mosaic_0001>
module attributes {stable_mosaic.version = 11 : i64} {
  func.func @kernel(%arg0: i32, %arg1: i32, %arg2: i32, %arg3: memref<8x1024xf32, #tpu.memory_space<vmem>>, %arg4: memref<8x128xf32, #tpu.memory_space<vmem>>) attributes {dimension_semantics = [#tpu.dimension_semantics<parallel>, #tpu.dimension_semantics<parallel>, #tpu.dimension_semantics<arbitrary>], iteration_bounds = array<i64: 1, 1, 1>, scalar_prefetch = 0 : i64, scratch_operands = 0 : i64, tpu.core_type = #tpu.core_type<tc>, window_params = [{transform_indices = @transform_0, window_bounds = array<i64: 8, 1024>}, {transform_indices = @transform_1, window_bounds = array<i64: 8, 128>}]} {
    %c0_i32 = arith.constant 0 : i32
    %0 = arith.cmpi eq, %arg2, %c0_i32 : i32
    %1 = arith.extui %0 : i1 to i32
    %c0_i32_0 = arith.constant 0 : i32
    %2 = arith.cmpi ne, %1, %c0_i32_0 : i32
    scf.if %2 {
      %cst_13 = arith.constant 0.000000e+00 : f32
      %31 = vector.broadcast %cst_13 : f32 to vector<8x128xf32>
      %c0_14 = arith.constant 0 : index
      %c0_15 = arith.constant 0 : index
      %32 = vector.load %arg4[%c0_14, %c0_15] : memref<8x128xf32, #tpu.memory_space<vmem>>, vector<8x128xf32>
      tpu.vector_store %arg4[%c0_14, %c0_15], %31 {strides = array<i32>} : memref<8x128xf32, #tpu.memory_space<vmem>>, vector<8x128xf32>,
    } else {
    }
    %cst = arith.constant 0.000000e+00 : f32
    %3 = vector.broadcast %cst : f32 to vector<8x128xf32>
    %c0 = arith.constant 0 : index
    %c0_1 = arith.constant 0 : index
    %4 = vector.load %arg3[%c0, %c0_1] : memref<8x1024xf32, #tpu.memory_space<vmem>>, vector<8x128xf32>
    %5 = arith.mulf %4, %4 : vector<8x128xf32>
    %6 = arith.addf %3, %5 : vector<8x128xf32>
    %c0_2 = arith.constant 0 : index
    %c128 = arith.constant 128 : index
    %7 = vector.load %arg3[%c0_2, %c128] : memref<8x1024xf32, #tpu.memory_space<vmem>>, vector<8x128xf32>
    %8 = arith.mulf %7, %7 : vector<8x128xf32>
    %9 = arith.addf %6, %8 : vector<8x128xf32>
    %c0_3 = arith.constant 0 : index
    %c256 = arith.constant 256 : index
    %10 = vector.load %arg3[%c0_3, %c256] : memref<8x1024xf32, #tpu.memory_space<vmem>>, vector<8x128xf32>
    %11 = arith.mulf %10, %10 : vector<8x128xf32>
    %12 = arith.addf %9, %11 : vector<8x128xf32>
    %c0_4 = arith.constant 0 : index
    %c384 = arith.constant 384 : index
    %13 = vector.load %arg3[%c0_4, %c384] : memref<8x1024xf32, #tpu.memory_space<vmem>>, vector<8x128xf32>
    %14 = arith.mulf %13, %13 : vector<8x128xf32>
    %15 = arith.addf %12, %14 : vector<8x128xf32>
    %c0_5 = arith.constant 0 : index
    %c512 = arith.constant 512 : index
    %16 = vector.load %arg3[%c0_5, %c512] : memref<8x1024xf32, #tpu.memory_space<vmem>>, vector<8x128xf32>
    %17 = arith.mulf %16, %16 : vector<8x128xf32>
    %18 = arith.addf %15, %17 : vector<8x128xf32>
    %c0_6 = arith.constant 0 : index
    %c640 = arith.constant 640 : index
    %19 = vector.load %arg3[%c0_6, %c640] : memref<8x1024xf32, #tpu.memory_space<vmem>>, vector<8x128xf32>
    %20 = arith.mulf %19, %19 : vector<8x128xf32>
    %21 = arith.addf %18, %20 : vector<8x128xf32>
    %c0_7 = arith.constant 0 : index
    %c768 = arith.constant 768 : index
    %22 = vector.load %arg3[%c0_7, %c768] : memref<8x1024xf32, #tpu.memory_space<vmem>>, vector<8x128xf32>
    %23 = arith.mulf %22, %22 : vector<8x128xf32>
    %24 = arith.addf %21, %23 : vector<8x128xf32>
    %c0_8 = arith.constant 0 : index
    %c896 = arith.constant 896 : index
    %25 = vector.load %arg3[%c0_8, %c896] : memref<8x1024xf32, #tpu.memory_space<vmem>>, vector<8x128xf32>
    %26 = arith.mulf %25, %25 : vector<8x128xf32>
    %27 = arith.addf %24, %26 : vector<8x128xf32>
    %c0_9 = arith.constant 0 : index
    %c0_10 = arith.constant 0 : index
    %28 = vector.load %arg4[%c0_9, %c0_10] : memref<8x128xf32, #tpu.memory_space<vmem>>, vector<8x128xf32>
    %29 = arith.addf %28, %27 : vector<8x128xf32>
    %c0_11 = arith.constant 0 : index
    %c0_12 = arith.constant 0 : index
    %30 = vector.load %arg4[%c0_11, %c0_12] : memref<8x128xf32, #tpu.memory_space<vmem>>, vector<8x128xf32>
    tpu.vector_store %arg4[%c0_11, %c0_12], %29 {strides = array<i32>} : memref<8x128xf32, #tpu.memory_space<vmem>>, vector<8x128xf32>,
    return
  }
  func.func @transform_0(%arg0: i32, %arg1: i32, %arg2: i32) -> (i32, i32) {
    %c1_i32 = arith.constant 1 : i32
    %0 = arith.muli %arg0, %c1_i32 : i32
    %1 = arith.addi %0, %arg2 : i32
    %c0_i32 = arith.constant 0 : i32
    return %arg1, %1 : i32, i32
  }
  func.func @transform_1(%arg0: i32, %arg1: i32, %arg2: i32) -> (i32, i32) {
    %c0_i32 = arith.constant 0 : i32
    return %arg1, %arg0 : i32, i32
  }
}

</mosaic_0001>

<bundles_post_ra>
// kernel: tpu_custom_call.1
= control target key start
LH: loop header
LB: loop body
LE: loop exit
PB: predicated region body
PF: predicated region fallthrough
CT: control target
= control target key end

     0   :  { %6 = vsyncpa [#allocation3], 0  ;;  %s161_s0 = inlined_call_operand.hbm [shape: f32[8,1024], index: 0, kind: input, shape index: {}]   ;;  %s162_s1 = inlined_call_operand.hbm [shape: f32[8,128], index: 1, kind: output, shape index: {}]  }
   0x1   :  { %7 = vsyncpa [#allocation4], 0  ;;  %s125_s6 = smov [#allocation2]   ;;  %s77_s10 = scalar_lea.hbm %s161_s0, 1024 }
   0x2   :  { %s18_s7 = sshll.u32 %s125_s6, 4  ;;  %p78_p0 = scmp.ne.s32.totalorder %s161_s0, %s77_s10  ;;  %s19_s7 = int_to_ptr.vmem [resolvable:$true] %s18_s7 }
   0x3   :  { %p81_p1 = scmp.lt.u32.totalorder %s77_s10, %s161_s0 }
   0x5   :  { %p83_p2 = pnand %p81_p1, %p78_p0 }
   0x7   :  { %86 = shalt.err (!%p83_p2)
}
   0x8   :  { %s87_s15 = scalar_lea.vmem %s19_s7, 1024  ;;  %p92_p4 = scmp.lt.s32.totalorder %s19_s7, %s19_s7 }
   0x9   :  { %p88_p3 = scmp.ne.s32.totalorder %s19_s7, %s87_s15  ;;  %p93_p5 = scmp.lt.s32.totalorder %s87_s15, %s87_s15 }
   0xb   :  { %p94_p6 = por %p93_p5, %p92_p4 }
   0xd   :  { %p95_p7 = pnand %p94_p6, %p88_p3 }
   0xf   :  { %98 = shalt.err (!%p95_p7)
}
  0x10   :  { %21 = dma.hbm_to_vmem [thread:$0]  %s161_s0, 1024, %s19_s7, [#allocation3]  }
  0x11   :  { %121 = dma.done.wait [#allocation3], 1024  }
  0x12   :  { %122 = vsyncadd [#allocation3], 4294966272  ;;  %v32_v0 = vld [vmem:[#allocation2] sm:$0xff]  ;;  %v35_v1 = vld [vmem:[#allocation2 + $0x8] sm:$0xff]  ;;  %s126_s0 = smov [#allocation5]  }
  0x13   :  { %v38_v2 = vld [vmem:[#allocation2 + $0x10] sm:$0xff]  ;;  %v33_v3 = vmul.f32 %v32_v0, %v32_v0  ;;  %v36_v4 = vmul.f32 %v35_v1, %v35_v1  ;;  %v41_v6 = vld [vmem:[#allocation2 + $0x18] sm:$0xff]  ;;  %v44_v7 = vld [vmem:[#allocation2 + $0x20] sm:$0xff]  ;;  %s65_s18 = sshll.u32 %s126_s0, 4  ;;  %s66_s18 = int_to_ptr.vmem [resolvable:$true] %s65_s18 }
  0x14   :  { %v39_v5 = vmul.f32 %v38_v2, %v38_v2  ;;  %v42_v9 = vmul.f32 %v41_v6, %v41_v6  ;;  %v47_v10 = vld [vmem:[#allocation2 + $0x28] sm:$0xff]  ;;  %v45_v12 = vmul.f32 %v44_v7, %v44_v7  ;;  %v50_v13 = vld [vmem:[#allocation2 + $0x30] sm:$0xff]  ;;  %v53_v16 = vld [vmem:[#allocation2 + $0x38] sm:$0xff]  ;;  %s99_s19 = scalar_lea.vmem %s66_s18, 128  ;;  %p104_p9 = scmp.lt.s32.totalorder %s66_s18, %s66_s18 }
  0x15   :  { %v37_v8 = vadd.f32 %v36_v4, %v33_v3  ;;  %v48_v15 = vmul.f32 %v47_v10, %v47_v10  ;;  %v51_v18 = vmul.f32 %v50_v13, %v50_v13  ;;  %v54_v20 = vmul.f32 %v53_v16, %v53_v16  ;;  %p100_p8 = scmp.ne.s32.totalorder %s66_s18, %s99_s19  ;;  %p105_p10 = scmp.lt.s32.totalorder %s99_s19, %s99_s19 }
  0x17   :  { %v40_v11 = vadd.f32 %v39_v5, %v37_v8  ;;  %p106_p11 = por %p105_p10, %p104_p9 }
  0x19   :  { %v43_v14 = vadd.f32 %v42_v9, %v40_v11  ;;  %p107_p12 = pnand %p106_p11, %p100_p8 }
  0x1b   :  { %v46_v17 = vadd.f32 %v45_v12, %v43_v14 }
  0x1d   :  { %v49_v19 = vadd.f32 %v48_v15, %v46_v17 }
  0x1f   :  { %v52_v21 = vadd.f32 %v51_v18, %v49_v19 }
  0x21   :  { %v55_v22 = vadd.f32 %v54_v20, %v52_v21 }
  0x23   :  { %58 = vst [vmem:[#allocation5] sm:$0xff] %v55_v22 }
  0x24   :  { %110 = shalt.err (!%p107_p12)
}
  0x25   :  { %s111_s22 = scalar_lea.hbm %s162_s1, 128 }
  0x26   :  { %p112_p13 = scmp.ne.s32.totalorder %s162_s1, %s111_s22  ;;  %p115_p0 = scmp.lt.u32.totalorder %s111_s22, %s162_s1 }
  0x28   :  { %p117_p1 = pnand %p115_p0, %p112_p13 }
  0x2a   :  { %120 = shalt.err (!%p117_p1)
}
  0x2b   :  { %68 = dma.vmem_to_hbm [thread:$0]  %s66_s18, 128, %s162_s1, [#allocation4]  }
  0x2c   :  { %123 = dma.done.wait [#allocation4], 128  }
  0x2d   :  { %124 = vsyncadd [#allocation4], 4294967168 }
  0x2e   :  { %72 = vsyncpa [#allocation3], 1 }
  0x2f   :  { %73 = vsyncpa [#allocation4], 1 }

</bundles_post_ra>
